<compile_context>
chip_gen: v7x
topology: tpu7x:2x2x1
jax: 0.10.0
libtpu: 0.0.40
codegen_flags: <defaults>
</compile_context>

<pallas_src>
import math
from functools import partial

import numpy as np
import jax
import jax.numpy as jnp
from jax.experimental import pallas as pl
from jax.experimental.pallas import tpu as pltpu


def _zernike_layer_constants(max_rank, skip_zero_order=True):
    """Per-(m, n) radial-polynomial factors/exponents, deterministic from config."""
    layers = []
    for rank in range(1 if skip_zero_order else 0, max_rank + 1):
        for angle in range(rank + 1):
            m, n = angle, rank
            a = (n + m) // 2
            b = (n - m) // 2
            facs, exps = [], []
            for k in range(b + 1):
                f = ((-1) ** k) * math.factorial(n - k) / (
                    math.factorial(k) * math.factorial(a - k) * math.factorial(b - k))
                facs.append(float(f))
                exps.append(int(n - 2 * k))
            layers.append((m, tuple(facs), tuple(exps)))
    return layers


def _mzp_kernel(x_ref, xx_ref, yy_ref, o_ref, *, layers, eps, hw, hwp, mask_r2,
                variance_norm, use_center_of_mass):
    x = x_ref[...]                       # (T, HWp) float32
    xx = xx_ref[...]                     # (1, HWp)  grid x-coordinate (varies along H)
    yy = yy_ref[...]                     # (1, HWp)  grid y-coordinate (varies along W)

    lanes_padded = hwp != hw

    # ---- variance normalization (torch.var is unbiased: /(HW-1)) ----
    if variance_norm:
        mean = jnp.sum(x, axis=-1, keepdims=True) * (1.0 / hw)
        d = x - mean
        if lanes_padded:
            valid = jax.lax.broadcasted_iota(jnp.int32, (1, hwp), 1) < hw
            d = jnp.where(valid, d, 0.0)
        var = jnp.sum(d * d, axis=-1, keepdims=True) * (1.0 / (hw - 1))
        xn = x * (1.0 / jnp.maximum(var, eps))
    else:
        xn = x

    # ---- center of mass (padded lanes of x are zero, so they contribute 0) ----
    if use_center_of_mass:
        m00c = jnp.maximum(jnp.sum(xn, axis=-1, keepdims=True), eps)
        tx = jnp.sum(xn * xx, axis=-1, keepdims=True) / m00c
        ty = jnp.sum(xn * yy, axis=-1, keepdims=True) / m00c
        xxs = xx - tx                    # (T, HWp)
        yys = yy - ty
    else:
        xxs = xx                         # keep (1, HWp); broadcasts lazily below
        yys = yy

    r2 = xxs * xxs + yys * yys
    mask = jnp.where(r2 <= mask_r2, 1.0, 0.0)

    # ---- quantities shared by every layer (hoisted out of the layer loop) ----
    max_e = max(e for (_, _, exps) in layers for e in exps)
    need_r = any(e % 2 == 1 for (_, _, exps) in layers for e in exps)
    pows = [None] * (max_e + 1)
    if need_r:
        pows[1] = jnp.sqrt(r2)           # only EUP sqrt left in the kernel
    if max_e >= 2:
        pows[2] = r2
    for e in range(3, max_e + 1):
        if e % 2 == 1 and not need_r:
            continue
        pows[e] = pows[e - 2] * r2

    need_m0 = any(m == 0 for (m, _, _) in layers)
    need_m1 = any(m > 0 for (m, _, _) in layers)
    xm0 = mask * xn if need_m0 else None            # weight for m == 0 layers
    xm1 = mask * jnp.abs(xn) if need_m1 else None   # weight for m >= 1 layers

    # ---- shared lane-reduction "moments" ----
    # m==0 layers are linear in the radial polynomial, and single-term m>0
    # layers satisfy |radial| = |fac| * r^e (since r >= 0), so both kinds reduce
    # to moments sum(r^e * mask * {x, |x|}).  |zernike*x| = |radial|*mask*|x|
    # replaces the original sin/cos recurrence + per-element sqrt exactly.
    moment_keys = set()
    for m, facs, exps in layers:
        if m == 0:
            moment_keys.update((0, e) for e in exps)
        elif len(facs) == 1:
            moment_keys.add((1, exps[0]))
    moments = {}
    for kind, e in sorted(moment_keys):
        base = xm0 if kind == 0 else xm1
        img = base if e == 0 else pows[e] * base
        moments[(kind, e)] = jnp.sum(img, axis=-1, keepdims=True)

    outs = []
    for m, facs, exps in layers:
        if m == 0:
            # sum(radial * mask * x) == sum_k fac_k * moment_k  (linear)
            val = facs[0] * moments[(0, exps[0])]
            for f, e in zip(facs[1:], exps[1:]):
                val = val + f * moments[(0, e)]
        elif len(facs) == 1:
            # |radial| = |fac| * r^e  (r >= 0)
            val = abs(facs[0]) * moments[(1, exps[0])]
        else:
            # general m>0 radial (only occurs for max_rank >= 3)
            radial = facs[0] * pows[exps[0]]
            for f, e in zip(facs[1:], exps[1:]):
                radial = radial + f * pows[e]
            val = jnp.sum(jnp.abs(radial) * xm1, axis=-1, keepdims=True)
        outs.append(val)

    o_ref[...] = jnp.concatenate(outs, axis=-1)     # (T, L)


def _round_down_pow2(v):
    p = 8
    while p * 2 <= v:
        p *= 2
    return p


def _choose_tile_bc(bc, hwp, requested=None):
    """Pick the row-tile: as big as a conservative VMEM budget allows."""
    bc8 = ((bc + 7) // 8) * 8
    if requested is not None:
        t = max(8, min(int(requested), bc8))
        return max(8, (t // 8) * 8)
    budget_bytes = 20 * 1024 * 1024          # live f32 temporaries budget (safe on v7x 64 MiB)
    bytes_per_row = 16 * hwp * 4             # ~16 live (tile, HWp) f32 arrays (incl. dbl-buf input)
    t = max(8, budget_bytes // bytes_per_row)
    t = min(t, 1024, bc8)
    t = _round_down_pow2(t)
    # Keep >= 2 grid steps when the problem is big enough so a 2-TensorCore
    # chip (v7x) can shard the "parallel" grid axis across cores.
    if bc8 >= 16 and bc8 // t < 2:
        t = max(8, _round_down_pow2(bc8 // 2))
    return t


def multiple_zernike_pooling(x, *, max_rank=2, variance_norm=True,
                             filters_pad=0.1, circle_mask_pad=0.05,
                             use_center_of_mass=True, skip_zero_order=True,
                             eps=1e-5, tile_bc=None):
    B, C, H, W = x.shape
    assert H == W, "spatial dims must be square"
    N = H
    HW = N * N
    HWp = ((HW + 127) // 128) * 128          # lane-dense reduction axis

    layers = _zernike_layer_constants(max_rank, skip_zero_order)
    L = len(layers)

    # Deterministic "parameters" (buffers) from the module __init__.
    coords = np.linspace(-1.0 - filters_pad, 1.0 + filters_pad, N,
                         dtype=np.float64).astype(np.float32)
    xx_np, yy_np = np.meshgrid(coords, coords, indexing="ij")  # xx varies along H
    xx_flat = np.zeros((1, HWp), dtype=np.float32)
    yy_flat = np.zeros((1, HWp), dtype=np.float32)
    xx_flat[0, :HW] = xx_np.reshape(-1)
    yy_flat[0, :HW] = yy_np.reshape(-1)
    xx = jnp.asarray(xx_flat)
    yy = jnp.asarray(yy_flat)

    BC = B * C
    tile = _choose_tile_bc(BC, HWp, tile_bc)
    BCp = ((BC + tile - 1) // tile) * tile

    x2 = x.astype(jnp.float32).reshape(BC, HW)
    if BCp != BC or HWp != HW:
        x2 = jnp.pad(x2, ((0, BCp - BC), (0, HWp - HW)))

    kernel = partial(_mzp_kernel, layers=tuple(layers), eps=float(eps),
                     hw=HW, hwp=HWp,
                     mask_r2=float(1.0 - filters_pad - circle_mask_pad),
                     variance_norm=variance_norm,
                     use_center_of_mass=use_center_of_mass)

    out = pl.pallas_call(
        kernel,
        out_shape=jax.ShapeDtypeStruct((BCp, L), jnp.float32),
        grid_spec=pltpu.PrefetchScalarGridSpec(
            num_scalar_prefetch=0,
            grid=(BCp // tile,),
            in_specs=[
                pl.BlockSpec((tile, HWp), lambda i: (i, 0)),
                pl.BlockSpec((1, HWp), lambda i: (0, 0)),
                pl.BlockSpec((1, HWp), lambda i: (0, 0)),
            ],
            out_specs=pl.BlockSpec((tile, L), lambda i: (i, 0)),
        ),
        compiler_params=pltpu.CompilerParams(
            dimension_semantics=("parallel",),
            vmem_limit_bytes=48 * 1024 * 1024),
    )(x2, xx, yy)

    out = out[:BC].reshape(B, C, L)
    return jnp.transpose(out, (0, 2, 1))            # (B, L, C) == torch.stack(dim=1)


def _reference(x, *, max_rank=2, variance_norm=True, filters_pad=0.1,
               circle_mask_pad=0.05, use_center_of_mass=True,
               skip_zero_order=True, eps=1e-5):
    """Pure-JAX mirror of the PyTorch forward (for validation)."""
    B, C, H, W = x.shape
    N = H
    layers = _zernike_layer_constants(max_rank, skip_zero_order)
    coords = np.linspace(-1.0 - filters_pad, 1.0 + filters_pad, N,
                         dtype=np.float64).astype(np.float32)
    xx0_np, yy0_np = np.meshgrid(coords, coords, indexing="ij")
    xx0 = jnp.asarray(xx0_np)
    yy0 = jnp.asarray(yy0_np)
    poly10 = jnp.asarray(coords).reshape(1, 1, N, 1)   # coords along H (dim 2)
    poly01 = jnp.asarray(coords).reshape(1, 1, 1, N)   # coords along W (dim 3)
    thresh = 1.0 - filters_pad - circle_mask_pad

    x = x.astype(jnp.float32)
    if variance_norm:
        var = jnp.var(x, axis=(2, 3), keepdims=True, ddof=1)
        xn = x / jnp.maximum(var, eps)
    else:
        xn = x

    outs = []
    for m, facs, exps in layers:
        if use_center_of_mass:
            m00 = jnp.sum(xn, axis=(2, 3), keepdims=True)
            tx = jnp.sum(xn * poly10, axis=(2, 3), keepdims=True) / jnp.maximum(m00, eps)
            ty = jnp.sum(xn * poly01, axis=(2, 3), keepdims=True) / jnp.maximum(m00, eps)
            xx = xx0 - tx
            yy = yy0 - ty
        else:
            xx = jnp.broadcast_to(xx0, x.shape)
            yy = jnp.broadcast_to(yy0, x.shape)
        r = jnp.sqrt(xx ** 2 + yy ** 2)
        radial = jnp.zeros_like(r)
        for f, e in zip(facs, exps):
            radial = radial + f * (r ** e)
        mask = (xx ** 2 + yy ** 2 <= thresh).astype(x.dtype)
        if m == 0:
            out = jnp.sum(radial * mask * xn, axis=(2, 3))
        else:
            theta = jnp.arctan2(yy, xx)
            zr = radial * jnp.sin(m * theta) * mask
            zi = radial * jnp.cos(m * theta) * mask
            out = jnp.sum(jnp.sqrt((zr * xn) ** 2 + (zi * xn) ** 2), axis=(2, 3))
        outs.append(out)
    return jnp.stack(outs, axis=1)                     # (B, L, C)


if __name__ == "__main__":
    key = jax.random.PRNGKey(0)
    B, C, N = 2, 4, 16
    max_rank = 2
    x = jax.random.normal(key, (B, C, N, N), dtype=jnp.float32)

    out = multiple_zernike_pooling(x, max_rank=max_rank)
    out = jax.block_until_ready(out)

    ref = _reference(x, max_rank=max_rank)
    assert out.shape == ref.shape, (out.shape, ref.shape)
    np.testing.assert_allclose(np.asarray(out), np.asarray(ref),
                               rtol=2e-3, atol=2e-3)
    print("KERNEL_OK")
</pallas_src>

<mosaic_0001>
module attributes {stable_mosaic.version = 11 : i64} {
  func.func @_mzp_kernel(%arg0: i32, %arg1: memref<8x256xf32, #tpu.memory_space<vmem>>, %arg2: memref<1x256xf32, #tpu.memory_space<vmem>>, %arg3: memref<1x256xf32, #tpu.memory_space<vmem>>, %arg4: memref<8x5xf32, #tpu.memory_space<vmem>>) attributes {dimension_semantics = [#tpu.dimension_semantics<parallel>], iteration_bounds = array<i64: 1>, scalar_prefetch = 0 : i64, scratch_operands = 0 : i64, tpu.core_type = #tpu.core_type<tc>, window_params = [{transform_indices = @transform_0, window_bounds = array<i64: 8, 256>}, {pipeline_mode = #tpu.pipeline_mode<synchronous>, transform_indices = @transform_1, window_bounds = array<i64: 1, 256>}, {pipeline_mode = #tpu.pipeline_mode<synchronous>, transform_indices = @transform_2, window_bounds = array<i64: 1, 256>}, {transform_indices = @transform_3, window_bounds = array<i64: 8, 5>}]} {
    %c0 = arith.constant 0 : index
    %c0_0 = arith.constant 0 : index
    %0 = vector.load %arg1[%c0, %c0_0] : memref<8x256xf32, #tpu.memory_space<vmem>>, vector<8x256xf32>
    %c0_1 = arith.constant 0 : index
    %c0_2 = arith.constant 0 : index
    %1 = vector.load %arg2[%c0_1, %c0_2] : memref<1x256xf32, #tpu.memory_space<vmem>>, vector<1x256xf32>
    %c0_3 = arith.constant 0 : index
    %c0_4 = arith.constant 0 : index
    %2 = vector.load %arg3[%c0_3, %c0_4] : memref<1x256xf32, #tpu.memory_space<vmem>>, vector<1x256xf32>
    %cst = arith.constant dense<0.000000e+00> : vector<8xf32>
    %3 = vector.multi_reduction <add>, %0, %cst [1] : vector<8x256xf32> to vector<8xf32>
    %4 = vector.shape_cast %3 : vector<8xf32> to vector<8x1xf32>
    %cst_5 = arith.constant 3.906250e-03 : f32
    %5 = vector.broadcast %cst_5 : f32 to vector<8x1xf32>
    %6 = arith.mulf %4, %5 : vector<8x1xf32>
    %7 = vector.broadcast %6 : vector<8x1xf32> to vector<8x256xf32>
    %8 = arith.subf %0, %7 : vector<8x256xf32>
    %9 = arith.mulf %8, %8 : vector<8x256xf32>
    %cst_6 = arith.constant dense<0.000000e+00> : vector<8xf32>
    %10 = vector.multi_reduction <add>, %9, %cst_6 [1] : vector<8x256xf32> to vector<8xf32>
    %11 = vector.shape_cast %10 : vector<8xf32> to vector<8x1xf32>
    %cst_7 = arith.constant 0.00392156886 : f32
    %12 = vector.broadcast %cst_7 : f32 to vector<8x1xf32>
    %13 = arith.mulf %11, %12 : vector<8x1xf32>
    %cst_8 = arith.constant 9.99999974E-6 : f32
    %14 = vector.broadcast %cst_8 : f32 to vector<8x1xf32>
    %15 = arith.maximumf %13, %14 : vector<8x1xf32>
    %cst_9 = arith.constant 1.000000e+00 : f32
    %16 = vector.broadcast %cst_9 : f32 to vector<8x1xf32>
    %17 = arith.divf %16, %15 : vector<8x1xf32>
    %18 = vector.broadcast %17 : vector<8x1xf32> to vector<8x256xf32>
    %19 = arith.mulf %0, %18 : vector<8x256xf32>
    %cst_10 = arith.constant dense<0.000000e+00> : vector<8xf32>
    %20 = vector.multi_reduction <add>, %19, %cst_10 [1] : vector<8x256xf32> to vector<8xf32>
    %21 = vector.shape_cast %20 : vector<8xf32> to vector<8x1xf32>
    %cst_11 = arith.constant 9.99999974E-6 : f32
    %22 = vector.broadcast %cst_11 : f32 to vector<8x1xf32>
    %23 = arith.maximumf %21, %22 : vector<8x1xf32>
    %24 = vector.broadcast %1 : vector<1x256xf32> to vector<8x256xf32>
    %25 = arith.mulf %19, %24 : vector<8x256xf32>
    %cst_12 = arith.constant dense<0.000000e+00> : vector<8xf32>
    %26 = vector.multi_reduction <add>, %25, %cst_12 [1] : vector<8x256xf32> to vector<8xf32>
    %27 = vector.shape_cast %26 : vector<8xf32> to vector<8x1xf32>
    %28 = arith.divf %27, %23 : vector<8x1xf32>
    %29 = vector.broadcast %2 : vector<1x256xf32> to vector<8x256xf32>
    %30 = arith.mulf %19, %29 : vector<8x256xf32>
    %cst_13 = arith.constant dense<0.000000e+00> : vector<8xf32>
    %31 = vector.multi_reduction <add>, %30, %cst_13 [1] : vector<8x256xf32> to vector<8xf32>
    %32 = vector.shape_cast %31 : vector<8xf32> to vector<8x1xf32>
    %33 = arith.divf %32, %23 : vector<8x1xf32>
    %34 = vector.broadcast %1 : vector<1x256xf32> to vector<8x256xf32>
    %35 = vector.broadcast %28 : vector<8x1xf32> to vector<8x256xf32>
    %36 = arith.subf %34, %35 : vector<8x256xf32>
    %37 = vector.broadcast %2 : vector<1x256xf32> to vector<8x256xf32>
    %38 = vector.broadcast %33 : vector<8x1xf32> to vector<8x256xf32>
    %39 = arith.subf %37, %38 : vector<8x256xf32>
    %40 = arith.mulf %36, %36 : vector<8x256xf32>
    %41 = arith.mulf %39, %39 : vector<8x256xf32>
    %42 = arith.addf %40, %41 : vector<8x256xf32>
    %cst_14 = arith.constant 8.500000e-01 : f32
    %43 = vector.broadcast %cst_14 : f32 to vector<8x256xf32>
    %44 = arith.cmpf ole, %42, %43 : vector<8x256xf32>
    %cst_15 = arith.constant 1.000000e+00 : f32
    %cst_16 = arith.constant 0.000000e+00 : f32
    %45 = vector.broadcast %cst_15 : f32 to vector<8x256xf32>
    %46 = vector.broadcast %cst_16 : f32 to vector<8x256xf32>
    %47 = arith.select %44, %45, %46 : vector<8x256xi1>, vector<8x256xf32>
    %48 = math.sqrt %42 : vector<8x256xf32>
    %49 = arith.mulf %47, %19 : vector<8x256xf32>
    %50 = math.absf %19 : vector<8x256xf32>
    %51 = arith.mulf %47, %50 : vector<8x256xf32>
    %cst_17 = arith.constant dense<0.000000e+00> : vector<8xf32>
    %52 = vector.multi_reduction <add>, %49, %cst_17 [1] : vector<8x256xf32> to vector<8xf32>
    %53 = vector.shape_cast %52 : vector<8xf32> to vector<8x1xf32>
    %54 = arith.mulf %48, %49 : vector<8x256xf32>
    %cst_18 = arith.constant dense<0.000000e+00> : vector<8xf32>
    %55 = vector.multi_reduction <add>, %54, %cst_18 [1] : vector<8x256xf32> to vector<8xf32>
    %56 = vector.shape_cast %55 : vector<8xf32> to vector<8x1xf32>
    %57 = arith.mulf %42, %49 : vector<8x256xf32>
    %cst_19 = arith.constant dense<0.000000e+00> : vector<8xf32>
    %58 = vector.multi_reduction <add>, %57, %cst_19 [1] : vector<8x256xf32> to vector<8xf32>
    %59 = vector.shape_cast %58 : vector<8xf32> to vector<8x1xf32>
    %60 = arith.mulf %48, %51 : vector<8x256xf32>
    %cst_20 = arith.constant dense<0.000000e+00> : vector<8xf32>
    %61 = vector.multi_reduction <add>, %60, %cst_20 [1] : vector<8x256xf32> to vector<8xf32>
    %62 = vector.shape_cast %61 : vector<8xf32> to vector<8x1xf32>
    %63 = arith.mulf %42, %51 : vector<8x256xf32>
    %cst_21 = arith.constant dense<0.000000e+00> : vector<8xf32>
    %64 = vector.multi_reduction <add>, %63, %cst_21 [1] : vector<8x256xf32> to vector<8xf32>
    %65 = vector.shape_cast %64 : vector<8xf32> to vector<8x1xf32>
    %cst_22 = arith.constant 1.000000e+00 : f32
    %66 = vector.broadcast %cst_22 : f32 to vector<8x1xf32>
    %67 = arith.mulf %66, %56 : vector<8x1xf32>
    %cst_23 = arith.constant 1.000000e+00 : f32
    %68 = vector.broadcast %cst_23 : f32 to vector<8x1xf32>
    %69 = arith.mulf %68, %62 : vector<8x1xf32>
    %cst_24 = arith.constant 2.000000e+00 : f32
    %70 = vector.broadcast %cst_24 : f32 to vector<8x1xf32>
    %71 = arith.mulf %70, %59 : vector<8x1xf32>
    %cst_25 = arith.constant -1.000000e+00 : f32
    %72 = vector.broadcast %cst_25 : f32 to vector<8x1xf32>
    %73 = arith.mulf %72, %53 : vector<8x1xf32>
    %74 = arith.addf %71, %73 : vector<8x1xf32>
    %cst_26 = arith.constant 2.000000e+00 : f32
    %75 = vector.broadcast %cst_26 : f32 to vector<8x1xf32>
    %76 = arith.mulf %75, %65 : vector<8x1xf32>
    %cst_27 = arith.constant 1.000000e+00 : f32
    %77 = vector.broadcast %cst_27 : f32 to vector<8x1xf32>
    %78 = arith.mulf %77, %65 : vector<8x1xf32>
    %79 = tpu.concatenate %67, %69, %74, %76, %78 in 1 : vector<8x1xf32>, vector<8x1xf32>, vector<8x1xf32>, vector<8x1xf32>, vector<8x1xf32> -> vector<8x5xf32>
    %c0_28 = arith.constant 0 : index
    %c0_29 = arith.constant 0 : index
    %80 = vector.load %arg4[%c0_28, %c0_29] : memref<8x5xf32, #tpu.memory_space<vmem>>, vector<8x5xf32>
    tpu.vector_store %arg4[%c0_28, %c0_29], %79 {strides = array<i32>} : memref<8x5xf32, #tpu.memory_space<vmem>>, vector<8x5xf32>,
    return
  }
  func.func @transform_0(%arg0: i32) -> (i32, i32) {
    %c0_i32 = arith.constant 0 : i32
    %c0_i32_0 = arith.constant 0 : i32
    return %arg0, %c0_i32 : i32, i32
  }
  func.func @transform_1(%arg0: i32) -> (i32, i32) {
    %c0_i32 = arith.constant 0 : i32
    %c0_i32_0 = arith.constant 0 : i32
    %c0_i32_1 = arith.constant 0 : i32
    return %c0_i32, %c0_i32_0 : i32, i32
  }
  func.func @transform_2(%arg0: i32) -> (i32, i32) {
    %c0_i32 = arith.constant 0 : i32
    %c0_i32_0 = arith.constant 0 : i32
    %c0_i32_1 = arith.constant 0 : i32
    return %c0_i32, %c0_i32_0 : i32, i32
  }
  func.func @transform_3(%arg0: i32) -> (i32, i32) {
    %c0_i32 = arith.constant 0 : i32
    %c0_i32_0 = arith.constant 0 : i32
    return %arg0, %c0_i32 : i32, i32
  }
}

</mosaic_0001>

<bundles_post_ra>
// kernel: tpu_custom_call.1
= control target key start
LH: loop header
LB: loop body
LE: loop exit
PB: predicated region body
PF: predicated region fallthrough
CT: control target
= control target key end

     0   :  { %8 = vsyncpa [#allocation3], 0  ;;  %s285_s0 = inlined_call_operand.hbm [shape: f32[8,256], index: 0, kind: input, shape index: {}]   ;;  %s286_s1 = inlined_call_operand.vmem [shape: f32[1,256], index: 1, kind: input, shape index: {}]   ;;  %s287_s2 = inlined_call_operand.vmem [shape: f32[1,256], index: 2, kind: input, shape index: {}]   ;;  %s288_s3 = inlined_call_operand.hbm [shape: f32[8,5], index: 3, kind: output, shape index: {}]  }
   0x1   :  { %9 = vsyncpa [#allocation4], 0  ;;  %s232_s12 = smov [#allocation2]   ;;  %s184_s16 = scalar_lea.hbm %s285_s0, 256 }
   0x2   :  { %s16_s13 = sshll.u32 %s232_s12, 4  ;;  %p185_p0 = scmp.ne.s32.totalorder %s285_s0, %s184_s16  ;;  %s17_s13 = int_to_ptr.vmem [resolvable:$true] %s16_s13 }
   0x3   :  { %p188_p1 = scmp.lt.u32.totalorder %s184_s16, %s285_s0 }
   0x5   :  { %p190_p2 = pnand %p188_p1, %p185_p0 }
   0x7   :  { %193 = shalt.err (!%p190_p2)
}
   0x8   :  { %s194_s21 = scalar_lea.vmem %s17_s13, 256  ;;  %p199_p4 = scmp.lt.s32.totalorder %s17_s13, %s17_s13 }
   0x9   :  { %p195_p3 = scmp.ne.s32.totalorder %s17_s13, %s194_s21  ;;  %p200_p5 = scmp.lt.s32.totalorder %s194_s21, %s194_s21 }
   0xb   :  { %p201_p6 = por %p200_p5, %p199_p4 }
   0xd   :  { %p202_p7 = pnand %p201_p6, %p195_p3 }
   0xf   :  { %205 = shalt.err (!%p202_p7)
}
  0x10   :  { %19 = dma.hbm_to_vmem [thread:$0]  %s285_s0, 256, %s17_s13, [#allocation3]  }
  0x11   :  { %228 = dma.done.wait [#allocation3], 256  }
  0x12   :  { %229 = vsyncadd [#allocation3], 4294967040  ;;  %v27_v0 = vld [vmem:[#allocation2] sm:$0xff]  ;;  %v28_v1 = vld [vmem:[#allocation2 + $0x8] sm:$0xff]  ;;  %v53_v12 = vlaneseq  ;;  %v233_v50 = vmov 0.0   ;;  %vm148_vm6 = vcmask 7168  }
  0x13   :  { %v31_v2 = vadd.f32 %v28_v1, %v27_v0  ;;  %v30_v17 = vld [vmem:[%s287_s2] sm:$0x3]  ;;  %vm150_vm7 = vcmask 15360   ;;  %vm152_vm8 = vcmask 23552   ;;  %vm154_vm9 = vcmask 31744  }
  0x14   :  { %v54_v14 = vshrl.u32 %v53_v12, 7  ;;  %v29_v18 = vld [vmem:[%s286_s1] sm:$0x3]  ;;  %s234_s1 = smov [#allocation5]   ;;  %vm156_vm10 = vcmask 39936  }
  0x15   :  { %32 = vadd.xlane.f32.xlu0 %v31_v2  ;;  %s164_s2 = sshll.u32 %s234_s1, 4  ;;  %s165_s2 = int_to_ptr.vmem [resolvable:$true] %s164_s2 }
  0x16   :  { %v55_v15 = vsub.s32 0, %v54_v14  ;;  %v59_v16 = vsub.s32 1, %v54_v14  ;;  %s206_s27 = scalar_lea.vmem %s165_s2, 128  ;;  %p211_p9 = scmp.lt.s32.totalorder %s165_s2, %s165_s2 }
  0x17   :  { %p207_p8 = scmp.ne.s32.totalorder %s165_s2, %s206_s27  ;;  %p212_p10 = scmp.lt.s32.totalorder %s206_s27, %s206_s27 }
  0x18   :  { %v74_v19 = vrot.slane %v30_v17, %v55_v15  ;;  %v78_v20 = vrot.slane %v30_v17, %v59_v16  ;;  %v56_v21 = vrot.slane %v29_v18, %v55_v15  ;;  %v60_v23 = vrot.slane %v29_v18, %v59_v16 }
  0x19   :  { %p213_p11 = por %p212_p10, %p211_p9 }
  0x1b   :  { %p214_p12 = pnand %p213_p11, %p207_p8 }
  0xa2   :  { %v33_v3 = vpop.xlane.xlu0 %32 }
  0xa3   :  { %v34_v4 = vmul.f32 0.00390625, %v33_v3 }
  0xa5   :  { %v35_v5 = vsub.f32 %v27_v0, %v34_v4  ;;  %v36_v6 = vsub.f32 %v28_v1, %v34_v4 }
  0xa7   :  { %v37_v7 = vmul.f32 %v35_v5, %v35_v5  ;;  %v38_v8 = vmul.f32 %v36_v6, %v36_v6 }
  0xa9   :  { %v39_v9 = vadd.f32 %v38_v8, %v37_v7 }
  0xab   :  { %40 = vadd.xlane.f32.xlu0 %v39_v9 }
 0x138   :  { %v41_v10 = vpop.xlane.xlu0 %40 }
 0x139   :  { %v42_v11 = vmul.f32 0.003921569, %v41_v10 }
 0x13b   :  { %v43_v13 = vmax.f32 %v42_v11, 1e-05 }
 0x13d   :  { %176 = vrcp.f32 %v43_v13 }
 0x147   :  { %v177_v22 = vpop.eup %176 }
 0x148   :  { %v46_v24 = vmul.f32 %v177_v22, %v27_v0  ;;  %v47_v25 = vmul.f32 %v177_v22, %v28_v1 }
 0x14a   :  { %v48_v26 = vadd.f32 %v47_v25, %v46_v24  ;;  %v81_v27 = vmul.f32 %v74_v19, %v46_v24  ;;  %v82_v28 = vmul.f32 %v78_v20, %v47_v25  ;;  %v63_v29 = vmul.f32 %v56_v21, %v46_v24 }
 0x14b   :  { %v64_v30 = vmul.f32 %v60_v23, %v47_v25  ;;  %v117_v61 = vand.u32 2147483647, %v46_v24  ;;  %v118_v0 = vand.u32 2147483647, %v47_v25 }
 0x14c   :  { %49 = vadd.xlane.f32.xlu1 %v48_v26  ;;  %v83_v31 = vadd.f32 %v82_v28, %v81_v27 }
 0x14d   :  { %v65_v32 = vadd.f32 %v64_v30, %v63_v29 }
 0x14e   :  { %84 = vadd.xlane.f32.xlu0 %v83_v31 }
 0x150   :  { %66 = vadd.xlane.f32.xlu1 %v65_v32 }
 0x1d9   :  { %v50_v33 = vpop.xlane.xlu1 %49 }
 0x1da   :  { %v51_v34 = vmax.f32 %v50_v33, 1e-05 }
 0x1db   :  { %v85_v36 = vpop.xlane.xlu0 %84 }
 0x1dc   :  { %178 = vrcp.f32 %v51_v34 }
 0x1dd   :  { %v67_v37 = vpop.xlane.xlu1 %66 }
 0x1e6   :  { %v179_v35 = vpop.eup %178 }
 0x1e7   :  { %v86_v38 = vmul.f32 %v179_v35, %v85_v36  ;;  %v69_v39 = vmul.f32 %v179_v35, %v67_v37 }
 0x1e9   :  { %v89_v40 = vsub.f32 %v74_v19, %v86_v38  ;;  %v90_v41 = vsub.f32 %v78_v20, %v86_v38  ;;  %v87_v42 = vsub.f32 %v56_v21, %v69_v39  ;;  %v88_v43 = vsub.f32 %v60_v23, %v69_v39 }
 0x1eb   :  { %v93_v44 = vmul.f32 %v89_v40, %v89_v40  ;;  %v94_v45 = vmul.f32 %v90_v41, %v90_v41  ;;  %v91_v46 = vmul.f32 %v87_v42, %v87_v42  ;;  %v92_v47 = vmul.f32 %v88_v43, %v88_v43 }
 0x1ed   :  { %v95_v48 = vadd.f32 %v93_v44, %v91_v46  ;;  %v96_v49 = vadd.f32 %v94_v45, %v92_v47 }
 0x1ef   :  { %vm97_vm0 = vcmp.le.f32.partialorder %v95_v48, 0.85  ;;  %vm98_vm1 = vcmp.le.f32.partialorder %v96_v49, 0.85  ;;  %180 = vrsqrt.f32 %v95_v48  ;;  %vm103_vm2 = vcmp.eq.f32.partialorder %v95_v48, inf }
 0x1f0   :  { %v99_v51 = vsel %vm97_vm0, 1.0, %v233_v50  ;;  %v100_v52 = vsel %vm98_vm1, 1.0, %v233_v50  ;;  %182 = vrsqrt.f32 %v96_v49  ;;  %v106_v63 = vand.u32 2147483648, %v95_v48 }
 0x1f1   :  { %v115_v53 = vmul.f32 %v99_v51, %v46_v24  ;;  %v116_v54 = vmul.f32 %v100_v52, %v47_v25  ;;  %vm105_vm3 = vcmp.eq.f32.partialorder %v95_v48, 0.0  ;;  %v119_v3 = vmul.f32 %v117_v61, %v99_v51 }
 0x1f2   :  { %vm110_vm4 = vcmp.eq.f32.partialorder %v96_v49, inf  ;;  %vm112_vm5 = vcmp.eq.f32.partialorder %v96_v49, 0.0  ;;  %v113_v5 = vand.u32 2147483648, %v96_v49  ;;  %v120_v7 = vmul.f32 %v118_v0, %v100_v52 }
 0x1f3   :  { %v121_v55 = vadd.f32 %v116_v54, %v115_v53  ;;  %v129_v56 = vmul.f32 %v115_v53, %v95_v48  ;;  %v130_v57 = vmul.f32 %v116_v54, %v96_v49  ;;  %v139_v15 = vmul.f32 %v119_v3, %v95_v48 }
 0x1f4   :  { %v140_v16 = vmul.f32 %v120_v7, %v96_v49 }
 0x1f5   :  { %122 = vadd.xlane.f32.xlu1 %v121_v55  ;;  %v131_v58 = vadd.f32 %v130_v57, %v129_v56 }
 0x1f6   :  { %v141_v17 = vadd.f32 %v140_v16, %v139_v15 }
 0x1f7   :  { %132 = vadd.xlane.f32.xlu0 %v131_v58 }
 0x1f9   :  { %v181_v59 = vpop.eup %180 }
 0x1fa   :  { %v102_v60 = vmul.f32 %v181_v59, %v95_v48  ;;  %v183_v62 = vpop.eup %182 }
 0x1fb   :  { %v109_v2 = vmul.f32 %v183_v62, %v96_v49 }
 0x1fc   :  { %v104_v1 = vsel %vm103_vm2, %v95_v48, %v102_v60 }
 0x1fd   :  { %v107_v4 = vsel %vm105_vm3, %v106_v63, %v104_v1  ;;  %v111_v6 = vsel %vm110_vm4, %v96_v49, %v109_v2 }
 0x1fe   :  { %v134_v8 = vmul.f32 %v119_v3, %v107_v4  ;;  %v124_v9 = vmul.f32 %v115_v53, %v107_v4  ;;  %v114_v10 = vsel %vm112_vm5, %v113_v5, %v111_v6 }
 0x1ff   :  { %v135_v11 = vmul.f32 %v120_v7, %v114_v10  ;;  %v125_v12 = vmul.f32 %v116_v54, %v114_v10 }
 0x201   :  { %v136_v13 = vadd.f32 %v135_v11, %v134_v8  ;;  %v126_v14 = vadd.f32 %v125_v12, %v124_v9 }
 0x203   :  { %137 = vadd.xlane.f32.xlu0 %v136_v13  ;;  %127 = vadd.xlane.f32.xlu1 %v126_v14 }
 0x207   :  { %142 = vadd.xlane.f32.xlu1 %v141_v17 }
 0x282   :  { %v123_v18 = vpop.xlane.xlu1 %122 }
 0x283   :  { %v145_v23 = vmul.f32 -1.0, %v123_v18 }
 0x284   :  { %v133_v19 = vpop.xlane.xlu0 %132 }
 0x285   :  { %v144_v20 = vmul.f32 2.0, %v133_v19 }
 0x287   :  { %v146_v25 = vadd.f32 %v145_v23, %v144_v20 }
 0x290   :  { %v138_v21 = vpop.xlane.xlu0 %137  ;;  %v128_v22 = vpop.xlane.xlu1 %127 }
 0x291   :  { %v149_v24 = vsel %vm148_vm6, %v128_v22, %v138_v21 }
 0x292   :  { %v151_v28 = vsel %vm150_vm7, %v149_v24, %v146_v25 }
 0x294   :  { %v143_v26 = vpop.xlane.xlu1 %142 }
 0x295   :  { %v147_v27 = vmul.f32 2.0, %v143_v26 }
 0x297   :  { %v153_v29 = vsel %vm152_vm8, %v151_v28, %v147_v27 }
 0x298   :  { %v155_v30 = vsel %vm154_vm9, %v153_v29, %v143_v26 }
 0x299   :  { %157 = vst.msk [vmem:[#allocation5] sm:$0xff] %vm156_vm10, %v155_v30 }
 0x29a   :  { %217 = shalt.err (!%p214_p12)
}
 0x29b   :  { %s218_s30 = scalar_lea.hbm %s288_s3, 128 }
 0x29c   :  { %p219_p13 = scmp.ne.s32.totalorder %s288_s3, %s218_s30  ;;  %p222_p0 = scmp.lt.u32.totalorder %s218_s30, %s288_s3 }
 0x29e   :  { %p224_p1 = pnand %p222_p0, %p219_p13 }
 0x2a0   :  { %227 = shalt.err (!%p224_p1)
}
 0x2a1   :  { %167 = dma.vmem_to_hbm [thread:$0]  %s165_s2, 128, %s288_s3, [#allocation4]  }
 0x2a2   :  { %230 = dma.done.wait [#allocation4], 128  }
 0x2a3   :  { %231 = vsyncadd [#allocation4], 4294967168 }
 0x2a4   :  { %171 = vsyncpa [#allocation3], 1 }
 0x2a5   :  { %172 = vsyncpa [#allocation4], 1 }

</bundles_post_ra>
